<compile_context>
chip_gen: v7x
topology: tpu7x:2x2x1
jax: 0.10.0
libtpu: 0.0.40
codegen_flags: <defaults>
</compile_context>

<pallas_src>
import jax
import jax.numpy as jnp
from jax.experimental import pallas as pl
from jax.experimental.pallas import tpu as pltpu

_MIB = 1024 * 1024


def _round_up(x, m):
    return (x + m - 1) // m * m


def _tpu_defaults():
    """Per-generation (tm, tf, vmem_capacity_bytes) defaults."""
    kind = ""
    try:
        kind = jax.devices()[0].device_kind.lower()
    except Exception:  # pragma: no cover - defensive
        pass
    vmem_cap = None
    try:
        vmem_cap = int(getattr(pltpu.get_tpu_info(), "vmem_capacity_bytes", 0)) or None
    except Exception:  # pragma: no cover - defensive
        vmem_cap = None

    if "v6" in kind:
        # v6e: 128 MiB VMEM, 918 TF/s @ 1.4 TB/s -> needs big M tiles.
        return 768, 512, vmem_cap or 128 * _MIB
    if "7x" in kind or "v7" in kind:
        # v7x: 64 MiB VMEM, 3.2 TB/s -> moderate tm, smaller d_ff tile.
        return 512, 256, vmem_cap or 64 * _MIB
    if "v5" in kind:
        # v5e: 128 MiB VMEM, 197 TF/s @ 0.82 TB/s -> moderate tiles suffice.
        return 384, 512, vmem_cap or 128 * _MIB
    # Unknown chip: conservative.
    return 384, 512, vmem_cap or 64 * _MIB


def _tf_candidates(d_ff, tf_max):
    """Descending list of valid d_ff tile sizes (128-multiples dividing d_ff)."""
    cands = [t for t in range(128, min(tf_max, d_ff) + 1, 128) if d_ff % t == 0]
    cands.sort(reverse=True)
    if not cands:
        cands = [d_ff]  # full d_ff block (always layout-legal)
    return cands


def _vmem_need(tm, tf, d_model, x_item, w_item, out_item):
    """Estimated VMEM working set (double-buffered tiles + scratch)."""
    return (
        2 * tm * d_model * x_item        # x tiles (double-buffered)
        + 2 * 2 * d_model * tf * w_item  # W1^T + W3^T tiles
        + 2 * tf * d_model * w_item      # W2^T tiles
        + 2 * tm * d_model * out_item    # output tiles
        + tm * d_model * 4               # f32 accumulator scratch
        + 2 * tm * tf * 4                # h1/h3 f32 intermediates
        + tm * tf * w_item               # gated (weight dtype)
    )


def swiglu_kernel(x_ref, w1_ref, w3_ref, w2_ref, o_ref, acc_ref):
    """One (M-tile, d_ff-tile) grid step.

    x_ref  : (tm, d_model)     input rows (resident across the d_ff axis)
    w1_ref : (d_model, tf)     W1^T columns for d_ff tile k
    w3_ref : (d_model, tf)     W3^T columns for d_ff tile k
    w2_ref : (tf, d_model)     W2^T rows for d_ff tile k
    o_ref  : (tm, d_model)     output tile (written on the last k step)
    acc_ref: (tm, d_model) f32 accumulator scratch
    """
    k = pl.program_id(1)

    @pl.when(k == 0)
    def _():
        acc_ref[...] = jnp.zeros_like(acc_ref)

    x = x_ref[...]
    h1 = jnp.dot(x, w1_ref[...], preferred_element_type=jnp.float32)
    h3 = jnp.dot(x, w3_ref[...], preferred_element_type=jnp.float32)
    gated = (h1 * jax.nn.sigmoid(h1) * h3).astype(w2_ref.dtype)
    # Partial second projection for this d_ff tile, accumulated in f32.
    acc_ref[...] += jnp.dot(gated, w2_ref[...], preferred_element_type=jnp.float32)

    @pl.when(k == pl.num_programs(1) - 1)
    def _():
        o_ref[...] = acc_ref[...].astype(o_ref.dtype)


def swiglu_pallas(x, w1, w2, w3, *, tm=None, tf=None):
    """SwiGLU forward.

    x: (..., d_model); w1, w3: (d_ff, d_model); w2: (d_model, d_ff)
    (PyTorch nn.Linear weight layout: (out_features, in_features)).
    """
    d_model = x.shape[-1]
    d_ff = w1.shape[0]
    orig_shape = x.shape

    tm_def, tf_def, vmem_cap = _tpu_defaults()
    if tm is None:
        tm = tm_def
    if tf is None:
        tf = tf_def

    x2d = x.reshape(-1, d_model)
    M = x2d.shape[0]

    # Clamp the row tile to the (8-aligned) problem size.
    tm = min(tm, _round_up(M, 8))
    tm = _round_up(tm, 8)

    # Pick a lane-aligned d_ff tile that divides d_ff.
    tf_cands = _tf_candidates(d_ff, tf)
    tf_i = 0
    tf = tf_cands[tf_i]

    # Shrink tiles until the double-buffered working set fits the VMEM cap
    # (~85% of physical so the compiler keeps internal-scratch headroom).
    request_cap = min(int(vmem_cap * 0.85), vmem_cap - 8 * _MIB)
    headroom = 4 * _MIB
    x_item = x2d.dtype.itemsize
    w_item = w1.dtype.itemsize
    out_item = x2d.dtype.itemsize
    while _vmem_need(tm, tf, d_model, x_item, w_item, out_item) + headroom > request_cap:
        if tf_i + 1 < len(tf_cands):
            tf_i += 1
            tf = tf_cands[tf_i]
        elif tm > 8:
            tm = max(8, _round_up(tm // 2, 8))
        else:
            break
    n_kt = d_ff // tf

    # Pad rows to a multiple of tm (padded rows give zeros; sliced off below).
    M_pad = _round_up(M, tm)
    if M_pad != M:
        x2d = jnp.pad(x2d, ((0, M_pad - M), (0, 0)))

    # TODO(synk): in production, store/caches the pre-transposed weights
    # ((d_model, d_ff) for W1/W3, (d_ff, d_model) for W2) instead of
    # transposing on every forward call.
    w1_t = w1.T  # (d_model, d_ff)
    w3_t = w3.T  # (d_model, d_ff)
    w2_t = w2.T  # (d_ff, d_model)

    grid = (M_pad // tm, n_kt)

    vmem_need = _vmem_need(tm, tf, d_model, x_item, w_item, out_item)
    vmem_limit = int(min(request_cap, max(vmem_need + headroom, 32 * _MIB)))
    vmem_limit = max(vmem_limit, vmem_need + 2 * _MIB)

    n_m_tiles = M_pad // tm
    cost = pl.CostEstimate(
        flops=6 * M_pad * d_model * d_ff,
        transcendentals=M_pad * d_ff,
        bytes_accessed=(
            x2d.size * x_item
            + M_pad * d_model * out_item
            + n_m_tiles * (w1_t.size + w3_t.size) * w_item
            + n_m_tiles * w2_t.size * w_item
        ),
    )

    # TODO(synk): on v7x with a single M tile (decode), split the d_ff
    # reduction across the two TensorCores and sum the partials; the
    # "parallel" M axis alone provides no megacore parallelism there.
    out = pl.pallas_call(
        swiglu_kernel,
        out_shape=jax.ShapeDtypeStruct((M_pad, d_model), x.dtype),
        grid_spec=pltpu.PrefetchScalarGridSpec(
            num_scalar_prefetch=0,
            grid=grid,
            in_specs=[
                pl.BlockSpec((tm, d_model), lambda i, k: (i, 0)),
                pl.BlockSpec((d_model, tf), lambda i, k: (0, k)),
                pl.BlockSpec((d_model, tf), lambda i, k: (0, k)),
                pl.BlockSpec((tf, d_model), lambda i, k: (k, 0)),
            ],
            out_specs=pl.BlockSpec((tm, d_model), lambda i, k: (i, 0)),
            scratch_shapes=[pltpu.VMEM((tm, d_model), jnp.float32)],
        ),
        compiler_params=pltpu.CompilerParams(
            dimension_semantics=("parallel", "arbitrary"),
            vmem_limit_bytes=vmem_limit,
        ),
        cost_estimate=cost,
    )(x2d, w1_t, w3_t, w2_t)

    if M_pad != M:
        out = out[:M]
    return out.reshape(orig_shape)


def swiglu_ref(x, w1, w2, w3):
    h1 = jnp.einsum("...d,fd->...f", x, w1)
    h3 = jnp.einsum("...d,fd->...f", x, w3)
    g = h1 * jax.nn.sigmoid(h1) * h3
    return jnp.einsum("...f,df->...d", g, w2)


if __name__ == "__main__":
    batch, seq = 2, 8
    d_model = 64
    d_ff = 128  # SwiGLU hidden dim (d_ff passed explicitly, like in __init__)

    key = jax.random.PRNGKey(0)
    kx, k1, k2, k3 = jax.random.split(key, 4)

    x = jax.random.normal(kx, (batch, seq, d_model), dtype=jnp.float32)
    # Deterministic synthetic weights, PyTorch Linear layout (out_features, in_features).
    w1 = jax.random.normal(k1, (d_ff, d_model), dtype=jnp.float32) * 0.05
    w2 = jax.random.normal(k2, (d_model, d_ff), dtype=jnp.float32) * 0.05
    w3 = jax.random.normal(k3, (d_ff, d_model), dtype=jnp.float32) * 0.05

    y = swiglu_pallas(x, w1, w2, w3)
    jax.block_until_ready(y)

    y_ref = swiglu_ref(x, w1, w2, w3)
    assert y.shape == (batch, seq, d_model)
    assert jnp.allclose(y, y_ref, atol=1e-3, rtol=1e-3)

    print("KERNEL_OK")
</pallas_src>

<mosaic_0001>
module attributes {stable_mosaic.version = 11 : i64} {
  func.func @swiglu_kernel(%arg0: i32, %arg1: i32, %arg2: memref<16x64xf32, #tpu.memory_space<vmem>>, %arg3: memref<64x128xf32, #tpu.memory_space<vmem>>, %arg4: memref<64x128xf32, #tpu.memory_space<vmem>>, %arg5: memref<128x64xf32, #tpu.memory_space<vmem>>, %arg6: memref<16x64xf32, #tpu.memory_space<vmem>>, %arg7: memref<16x64xf32, #tpu.memory_space<vmem>>) attributes {dimension_semantics = [#tpu.dimension_semantics<parallel>, #tpu.dimension_semantics<arbitrary>], iteration_bounds = array<i64: 1, 1>, scalar_prefetch = 0 : i64, scratch_operands = 1 : i64, tpu.core_type = #tpu.core_type<tc>, window_params = [{transform_indices = @transform_0, window_bounds = array<i64: 16, 64>}, {transform_indices = @transform_1, window_bounds = array<i64: 64, 128>}, {transform_indices = @transform_2, window_bounds = array<i64: 64, 128>}, {transform_indices = @transform_3, window_bounds = array<i64: 128, 64>}, {transform_indices = @transform_4, window_bounds = array<i64: 16, 64>}]} {
    %c0_i32 = arith.constant 0 : i32
    %0 = arith.cmpi eq, %arg1, %c0_i32 : i32
    %1 = arith.extui %0 : i1 to i32
    %c0_i32_0 = arith.constant 0 : i32
    %2 = arith.cmpi ne, %1, %c0_i32_0 : i32
    scf.if %2 {
      %cst_17 = arith.constant 0.000000e+00 : f32
      %23 = vector.broadcast %cst_17 : f32 to vector<16x64xf32>
      %c0_18 = arith.constant 0 : index
      %c0_19 = arith.constant 0 : index
      %24 = vector.load %arg7[%c0_18, %c0_19] : memref<16x64xf32, #tpu.memory_space<vmem>>, vector<16x64xf32>
      tpu.vector_store %arg7[%c0_18, %c0_19], %23 {strides = array<i32>} : memref<16x64xf32, #tpu.memory_space<vmem>>, vector<16x64xf32>,
    } else {
    }
    %c0 = arith.constant 0 : index
    %c0_1 = arith.constant 0 : index
    %3 = vector.load %arg2[%c0, %c0_1] : memref<16x64xf32, #tpu.memory_space<vmem>>, vector<16x64xf32>
    %c0_2 = arith.constant 0 : index
    %c0_3 = arith.constant 0 : index
    %4 = vector.load %arg3[%c0_2, %c0_3] : memref<64x128xf32, #tpu.memory_space<vmem>>, vector<64x128xf32>
    %cst = arith.constant dense<0.000000e+00> : vector<16x128xf32>
    %5 = tpu.matmul %3, %4, %cst {dimension_numbers = #tpu.dot_dimension_numbers<[1], [0], [0], [1], [0, 0, 1, 1], [], []>} : vector<16x64xf32>, vector<64x128xf32>, vector<16x128xf32> -> vector<16x128xf32>
    %c0_4 = arith.constant 0 : index
    %c0_5 = arith.constant 0 : index
    %6 = vector.load %arg4[%c0_4, %c0_5] : memref<64x128xf32, #tpu.memory_space<vmem>>, vector<64x128xf32>
    %cst_6 = arith.constant dense<0.000000e+00> : vector<16x128xf32>
    %7 = tpu.matmul %3, %6, %cst_6 {dimension_numbers = #tpu.dot_dimension_numbers<[1], [0], [0], [1], [0, 0, 1, 1], [], []>} : vector<16x64xf32>, vector<64x128xf32>, vector<16x128xf32> -> vector<16x128xf32>
    %8 = arith.negf %5 : vector<16x128xf32>
    %9 = math.exp %8 : vector<16x128xf32>
    %cst_7 = arith.constant 1.000000e+00 : f32
    %10 = vector.broadcast %cst_7 : f32 to vector<16x128xf32>
    %11 = arith.addf %10, %9 : vector<16x128xf32>
    %12 = arith.divf %10, %11 : vector<16x128xf32>
    %13 = arith.mulf %5, %12 : vector<16x128xf32>
    %14 = arith.mulf %13, %7 : vector<16x128xf32>
    %c0_8 = arith.constant 0 : index
    %c0_9 = arith.constant 0 : index
    %15 = vector.load %arg7[%c0_8, %c0_9] : memref<16x64xf32, #tpu.memory_space<vmem>>, vector<16x64xf32>
    %c0_10 = arith.constant 0 : index
    %c0_11 = arith.constant 0 : index
    %16 = vector.load %arg5[%c0_10, %c0_11] : memref<128x64xf32, #tpu.memory_space<vmem>>, vector<128x64xf32>
    %cst_12 = arith.constant dense<0.000000e+00> : vector<16x64xf32>
    %17 = tpu.matmul %14, %16, %cst_12 {dimension_numbers = #tpu.dot_dimension_numbers<[1], [0], [0], [1], [0, 0, 1, 1], [], []>} : vector<16x128xf32>, vector<128x64xf32>, vector<16x64xf32> -> vector<16x64xf32>
    %18 = arith.addf %15, %17 : vector<16x64xf32>
    %c0_13 = arith.constant 0 : index
    %c0_14 = arith.constant 0 : index
    %19 = vector.load %arg7[%c0_13, %c0_14] : memref<16x64xf32, #tpu.memory_space<vmem>>, vector<16x64xf32>
    tpu.vector_store %arg7[%c0_13, %c0_14], %18 {strides = array<i32>} : memref<16x64xf32, #tpu.memory_space<vmem>>, vector<16x64xf32>,
    %c0_i32_15 = arith.constant 0 : i32
    %20 = arith.cmpi eq, %arg1, %c0_i32_15 : i32
    %21 = arith.extui %20 : i1 to i32
    %c0_i32_16 = arith.constant 0 : i32
    %22 = arith.cmpi ne, %21, %c0_i32_16 : i32
    scf.if %22 {
      %c0_17 = arith.constant 0 : index
      %c0_18 = arith.constant 0 : index
      %23 = vector.load %arg7[%c0_17, %c0_18] : memref<16x64xf32, #tpu.memory_space<vmem>>, vector<16x64xf32>
      %c0_19 = arith.constant 0 : index
      %c0_20 = arith.constant 0 : index
      %24 = vector.load %arg6[%c0_19, %c0_20] : memref<16x64xf32, #tpu.memory_space<vmem>>, vector<16x64xf32>
      tpu.vector_store %arg6[%c0_19, %c0_20], %23 {strides = array<i32>} : memref<16x64xf32, #tpu.memory_space<vmem>>, vector<16x64xf32>,
    } else {
    }
    return
  }
  func.func @transform_0(%arg0: i32, %arg1: i32) -> (i32, i32) {
    %c0_i32 = arith.constant 0 : i32
    %c0_i32_0 = arith.constant 0 : i32
    return %arg0, %c0_i32 : i32, i32
  }
  func.func @transform_1(%arg0: i32, %arg1: i32) -> (i32, i32) {
    %c0_i32 = arith.constant 0 : i32
    %c0_i32_0 = arith.constant 0 : i32
    return %c0_i32, %arg1 : i32, i32
  }
  func.func @transform_2(%arg0: i32, %arg1: i32) -> (i32, i32) {
    %c0_i32 = arith.constant 0 : i32
    %c0_i32_0 = arith.constant 0 : i32
    return %c0_i32, %arg1 : i32, i32
  }
  func.func @transform_3(%arg0: i32, %arg1: i32) -> (i32, i32) {
    %c0_i32 = arith.constant 0 : i32
    %c0_i32_0 = arith.constant 0 : i32
    return %arg1, %c0_i32 : i32, i32
  }
  func.func @transform_4(%arg0: i32, %arg1: i32) -> (i32, i32) {
    %c0_i32 = arith.constant 0 : i32
    %c0_i32_0 = arith.constant 0 : i32
    return %arg0, %c0_i32 : i32, i32
  }
}

</mosaic_0001>

<bundles_post_ra>
// kernel: tpu_custom_call.1
= control target key start
LH: loop header
LB: loop body
LE: loop exit
PB: predicated region body
PF: predicated region fallthrough
CT: control target
= control target key end

     0   :  { %vm22_vm0 = vcmask 523264   ;;  %s706_s0 = inlined_call_operand.vmem [shape: f32[16,64], index: 0, kind: input, shape index: {}]   ;;  %s707_s1 = inlined_call_operand.vmem [shape: f32[64,128], index: 1, kind: input, shape index: {}]   ;;  %s708_s2 = inlined_call_operand.vmem [shape: f32[64,128], index: 2, kind: input, shape index: {}]   ;;  %s709_s3 = inlined_call_operand.vmem [shape: f32[128,64], index: 3, kind: input, shape index: {}]   ;;  %s710_s4 = inlined_call_operand.hbm [shape: f32[16,64], index: 4, kind: output, shape index: {}]  }
   0x1   :  { %v27_v0 = vld [vmem:[%s707_s1] sm:$0xff]  ;;  %v28_v1 = vld [vmem:[%s707_s1 + $0x8] sm:$0xff]  ;;  %v29_v2 = vld [vmem:[%s707_s1 + $0x10] sm:$0xff] }
   0x2   :  { %v453_v3 = vpack.c.bf16 %v28_v1, %v27_v0  ;;  %v30_v4 = vld [vmem:[%s707_s1 + $0x18] sm:$0xff]  ;;  %v31_v6 = vld [vmem:[%s707_s1 + $0x20] sm:$0xff]  ;;  %v32_v7 = vld [vmem:[%s707_s1 + $0x28] sm:$0xff] }
   0x3   :  { %v457_v5 = vpack.c.bf16 %v30_v4, %v29_v2  ;;  %v25_v8 = vld [vmem:[%s706_s0] sm:$0xff]  ;;  %v461_v9 = vpack.c.bf16 %v32_v7, %v31_v6  ;;  %v33_v10 = vld [vmem:[%s707_s1 + $0x30] sm:$0xff]  ;;  %v34_v11 = vld [vmem:[%s707_s1 + $0x38] sm:$0xff] }
   0x4   :  { %454 = vmatprep.subr.bf16.mxu1 %v453_v3  ;;  %396 = vmatprep.mubr.msk.f32.mxu1 %vm22_vm0, %v25_v8 }
   0x5   :  { %456 = vmatpush3.bf16.msra.mxu1 %v453_v3 }
   0x6   :  { %458 = vmatprep.subr.bf16.mxu1 %v457_v5 }
   0x7   :  { %9 = vsyncpa [#allocation4], 0  ;;  %v465_v12 = vpack.c.bf16 %v34_v11, %v33_v10  ;;  %v117_v13 = vld [vmem:[%s708_s2] sm:$0xff]  ;;  %v118_v14 = vld [vmem:[%s708_s2 + $0x8] sm:$0xff]  ;;  %v553_v50 = vmov 0.0  }
   0x8   :  { %v469_v15 = vpack.c.bf16 %v118_v14, %v117_v13  ;;  %v119_v16 = vld [vmem:[%s708_s2 + $0x10] sm:$0xff]  ;;  %v120_v17 = vld [vmem:[%s708_s2 + $0x18] sm:$0xff]  ;;  %v26_v18 = vld [vmem:[%s706_s0 + $0x8] sm:$0xff]  ;;  %24 = vst.msk [vmem:[#allocation2 + $0x8] sm:$0xff] %vm22_vm0, %v553_v50 }
   0x9   :  { %460 = vmatpush3.bf16.msra.mxu1 %v457_v5  ;;  %v473_v19 = vpack.c.bf16 %v120_v17, %v119_v16  ;;  %v121_v20 = vld [vmem:[%s708_s2 + $0x20] sm:$0xff]  ;;  %v122_v21 = vld [vmem:[%s708_s2 + $0x28] sm:$0xff]  ;;  %v123_v23 = vld [vmem:[%s708_s2 + $0x30] sm:$0xff]  ;;  %23 = vst.msk [vmem:[#allocation2] sm:$0xff] %vm22_vm0, %v553_v50 }
   0xa   :  { %462 = vmatprep.subr.bf16.mxu1 %v461_v9  ;;  %v477_v22 = vpack.c.bf16 %v122_v21, %v121_v20  ;;  %v124_v24 = vld [vmem:[%s708_s2 + $0x38] sm:$0xff]  ;;  %v218_v26 = vld [vmem:[%s709_s3] sm:$0xff]  ;;  %v219_v27 = vld [vmem:[%s709_s3 + $0x8] sm:$0xff] }
   0xb   :  { %v481_v25 = vpack.c.bf16 %v124_v24, %v123_v23  ;;  %v485_v28 = vpack.c.bf16 %v219_v27, %v218_v26  ;;  %v220_v29 = vld [vmem:[%s709_s3 + $0x10] sm:$0xff]  ;;  %v221_v30 = vld [vmem:[%s709_s3 + $0x18] sm:$0xff]  ;;  %v222_v32 = vld [vmem:[%s709_s3 + $0x20] sm:$0xff] }
   0xc   :  { %v489_v31 = vpack.c.bf16 %v221_v30, %v220_v29  ;;  %v223_v33 = vld [vmem:[%s709_s3 + $0x28] sm:$0xff]  ;;  %v224_v35 = vld [vmem:[%s709_s3 + $0x30] sm:$0xff]  ;;  %v225_v36 = vld [vmem:[%s709_s3 + $0x38] sm:$0xff] }
   0xd   :  { %464 = vmatpush3.bf16.msra.mxu1 %v461_v9  ;;  %486 = vmatprep.subr.bf16.mxu0 %v485_v28  ;;  %v493_v34 = vpack.c.bf16 %v223_v33, %v222_v32  ;;  %v497_v37 = vpack.c.bf16 %v225_v36, %v224_v35  ;;  %v226_v38 = vld [vmem:[%s709_s3 + $0x40] sm:$0xff]  ;;  %v227_v39 = vld [vmem:[%s709_s3 + $0x48] sm:$0xff]  ;;  %v228_v41 = vld [vmem:[%s709_s3 + $0x50] sm:$0xff] }
   0xe   :  { %466 = vmatprep.subr.bf16.mxu1 %v465_v12  ;;  %488 = vmatpush3.bf16.msra.mxu0 %v485_v28  ;;  %v501_v40 = vpack.c.bf16 %v227_v39, %v226_v38  ;;  %v229_v42 = vld [vmem:[%s709_s3 + $0x58] sm:$0xff]  ;;  %v230_v44 = vld [vmem:[%s709_s3 + $0x60] sm:$0xff]  ;;  %v231_v45 = vld [vmem:[%s709_s3 + $0x68] sm:$0xff] }
   0xf   :  { %490 = vmatprep.subr.bf16.mxu0 %v489_v31  ;;  %v505_v43 = vpack.c.bf16 %v229_v42, %v228_v41  ;;  %v509_v46 = vpack.c.bf16 %v231_v45, %v230_v44  ;;  %v232_v47 = vld [vmem:[%s709_s3 + $0x70] sm:$0xff]  ;;  %v233_v48 = vld [vmem:[%s709_s3 + $0x78] sm:$0xff]  ;;  %v217_v3 = vld [vmem:[#allocation2 + $0x8] sm:$0xff]  ;;  %s554_s3 = smov [#allocation3]  }
  0x10   :  { %v513_v49 = vpack.c.bf16 %v233_v48, %v232_v47  ;;  %v216_v4 = vld [vmem:[#allocation2] sm:$0xff]  ;;  %s325_s26 = sshll.u32 %s554_s3, 4  ;;  %s326_s26 = int_to_ptr.vmem [resolvable:$true] %s325_s26 }
  0x11   :  { %468 = vmatpush3.bf16.msra.mxu1 %v465_v12  ;;  %s529_s2 = scalar_lea.vmem %s326_s26, 256  ;;  %p534_p1 = scmp.lt.s32.totalorder %s326_s26, %s326_s26 }
  0x12   :  { %470 = vmatprep.subr.bf16.mxu1 %v469_v15  ;;  %492 = vmatpush3.bf16.msra.mxu0 %v489_v31  ;;  %p530_p0 = scmp.ne.s32.totalorder %s326_s26, %s529_s2  ;;  %p535_p2 = scmp.lt.s32.totalorder %s529_s2, %s529_s2 }
  0x13   :  { %494 = vmatprep.subr.bf16.mxu0 %v493_v34 }
  0x14   :  { %397 = vmatmul.mubr.msk.f32.vlgmr.msra.gmra.mrb[0].mxu1 %vm22_vm0, %v26_v18  ;;  %p536_p3 = por %p535_p2, %p534_p1 }
  0x15   :  { %472 = vmatpush3.bf16.msra.mxu1 %v469_v15  ;;  %415 = vmatprep.mubr.msk.f32.mxu1 %vm22_vm0, %v25_v8 }
  0x16   :  { %474 = vmatprep.subr.bf16.mxu1 %v473_v19  ;;  %496 = vmatpush3.bf16.msra.mxu0 %v493_v34  ;;  %p537_p4 = pnand %p536_p3, %p530_p0 }
  0x17   :  { %498 = vmatprep.subr.bf16.mxu0 %v497_v37 }
  0x19   :  { %476 = vmatpush3.bf16.msra.mxu1 %v473_v19 }
  0x1a   :  { %478 = vmatprep.subr.bf16.mxu1 %v477_v22  ;;  %500 = vmatpush3.bf16.msra.mxu0 %v497_v37 }
  0x1b   :  { %502 = vmatprep.subr.bf16.mxu0 %v501_v40 }
  0x1d   :  { %480 = vmatpush3.bf16.msra.mxu1 %v477_v22 }
  0x1e   :  { %482 = vmatprep.subr.bf16.mxu1 %v481_v25  ;;  %504 = vmatpush3.bf16.msra.mxu0 %v501_v40 }
  0x1f   :  { %506 = vmatprep.subr.bf16.mxu0 %v505_v43 }
  0x21   :  { %484 = vmatpush3.bf16.msra.mxu1 %v481_v25 }
  0x22   :  { %508 = vmatpush3.bf16.msra.mxu0 %v505_v43 }
  0x23   :  { %510 = vmatprep.subr.bf16.mxu0 %v509_v46 }
  0x24   :  { %416 = vmatmul.mubr.msk.f32.vlgmr.msra.gmra.mrb[2].mxu1 %vm22_vm0, %v26_v18 }
  0x26   :  { %512 = vmatpush3.bf16.msra.mxu0 %v509_v46 }
  0x27   :  { %514 = vmatprep.subr.bf16.mxu0 %v513_v49 }
  0x2a   :  { %516 = vmatpush3.bf16.msra.mxu0 %v513_v49 }
  0xe7   :  { %v398_v51 = vpop.f32.mrb[0].mxu1 }
  0xe8   :  { %v341_v52 = vmul.f32 -1.442695, %v398_v51  ;;  %v108_v53 = vpop.f32.mrb[1].mxu1 }
  0xe9   :  { %v340_v54 = vmul.f32 -1.442695, %v108_v53 }
  0xea   :  { %521 = vpow2.f32 %v341_v52 }
  0xeb   :  { %523 = vpow2.f32 %v340_v54 }
  0xf4   :  { %v522_v55 = vpop.eup %521 }
  0xf5   :  { %v524_v56 = vpop.eup %523  ;;  %v207_v57 = vadd.f32 1.0, %v522_v55 }
  0xf6   :  { %v206_v58 = vadd.f32 1.0, %v524_v56 }
  0xf7   :  { %525 = vrcp.f32 %v207_v57  ;;  %v417_v59 = vpop.f32.mrb[2].mxu1 }
  0xf8   :  { %527 = vrcp.f32 %v206_v58  ;;  %v191_v60 = vpop.f32.mrb[3].mxu1 }
 0x101   :  { %v526_v61 = vpop.eup %525 }
 0x102   :  { %v528_v62 = vpop.eup %527  ;;  %v213_v63 = vmul.f32 %v526_v61, %v398_v51 }
 0x103   :  { %v212_v0 = vmul.f32 %v528_v62, %v108_v53 }
 0x104   :  { %v215_v1 = vmul.f32 %v417_v59, %v213_v63 }
 0x105   :  { %v214_v2 = vmul.f32 %v212_v0, %v191_v60 }
 0x107   :  { %450 = vmatprep.mubr.f32.mxu0 %v214_v2 }
 0x108   :  { %451 = vmatmul.mubr.f32.vlgmr.msra.gmra.mrb[0].mxu0 %v215_v1 }
 0x1db   :  { %v452_v5 = vpop.f32.mrb[0].mxu0 }
 0x1dc   :  { %v310_v6 = vadd.f32 %v452_v5, %v217_v3  ;;  %v300_v7 = vpop.f32.mrb[1].mxu0 }
 0x1dd   :  { %v309_v8 = vadd.f32 %v300_v7, %v216_v4 }
 0x1de   :  { %312 = vst.msk [vmem:[#allocation2 + $0x8] sm:$0xff] %vm22_vm0, %v310_v6 }
 0x1df   :  { %311 = vst.msk [vmem:[#allocation2] sm:$0xff] %vm22_vm0, %v309_v8 }
 0x1e5   :  { %v317_v9 = vld [vmem:[#allocation2 + $0x8] sm:$0xff] }
 0x1e6   :  { %v316_v10 = vld [vmem:[#allocation2] sm:$0xff]  ;;  %319 = vst.msk [vmem:[#allocation3 + $0x8] sm:$0xff] %vm22_vm0, %v317_v9 }
 0x1e7   :  { %318 = vst.msk [vmem:[#allocation3] sm:$0xff] %vm22_vm0, %v316_v10 }
 0x1e8   :  { %540 = shalt.err (!%p537_p4)
}
 0x1e9   :  { %s541_s29 = scalar_lea.hbm %s710_s4, 256 }
 0x1ea   :  { %p542_p5 = scmp.ne.s32.totalorder %s710_s4, %s541_s29  ;;  %p545_p6 = scmp.lt.u32.totalorder %s541_s29, %s710_s4 }
 0x1ec   :  { %p547_p7 = pnand %p545_p6, %p542_p5 }
 0x1ee   :  { %550 = shalt.err (!%p547_p7)
}
 0x1ef   :  { %s555_s8 = smov 128   ;;  %s556_s9 = smov 8  }
 0x1f0   :  { %331 = dma.vmem_to_hbm [thread:$0]  %s326_s26, 256, %s710_s4, [#allocation4], %s555_s8, %s555_s8, %s556_s9  }
 0x1f1   :  { %551 = dma.done.wait [#allocation4], 256  }
 0x1f2   :  { %552 = vsyncadd [#allocation4], 4294967040 }
 0x1f3   :  { %335 = vsyncpa [#allocation4], 1 }

</bundles_post_ra>
